<compile_context>
chip_gen: v7x
topology: tpu7x:2x2x1
jax: 0.10.0
libtpu: 0.0.40
codegen_flags: <defaults>
</compile_context>

<pallas_src>
import functools
import inspect

import numpy as np
import jax
import jax.numpy as jnp
from jax.experimental import pallas as pl
from jax.experimental.pallas import tpu as pltpu

_LANES = 128
_SUBLANES = 8


def _round_up(n, m):
    return ((n + m - 1) // m) * m


def _cdiv(a, b):
    return (a + b - 1) // b


def _mlp_kernel(x_ref, w1_ref, b1_ref, w2_ref, b2_ref, w3_ref, b3_ref, o_ref,
                *, batch, mask_tail):
    """One (tile_b, D) batch tile -> one lane-dense (1, tile_b) output row."""
    x = x_ref[...]                                                      # (tb, D)
    if mask_tail:
        # The last grid step's x block extends past the array; Pallas only DMAs the
        # valid rows and the overhang is stale VMEM. Zero it so the (discarded)
        # padded outputs stay finite and deterministic.
        tb = x_ref.shape[0]
        row = pl.program_id(0) * tb + jax.lax.broadcasted_iota(jnp.int32, x.shape, 0)
        x = jnp.where(row < batch, x, jnp.zeros_like(x))

    # Layer 1: (tb, D) @ (D, 32) -> f32 accumulate, f32 bias + ReLU.
    h1 = jnp.dot(x, w1_ref[...], preferred_element_type=jnp.float32)    # (tb, 32)
    h1 = jnp.maximum(h1 + b1_ref[...], 0.0)

    # Layer 2: (tb, 32) @ (32, 16).
    h2 = jnp.dot(h1.astype(w2_ref.dtype), w2_ref[...],
                 preferred_element_type=jnp.float32)                    # (tb, 16)
    h2 = jnp.maximum(h2 + b2_ref[...], 0.0)

    # Layer 3 (16 -> 1): contract the feature axis of h2 against the single w3 row
    # with the *batch* axis landing in the lane dimension, so the result is already
    # the lane-dense (1, tb) row we store — no (tb, 1) masked stores, no transpose
    # of a tall column.
    z = jax.lax.dot_general(
        w3_ref[...], h2.astype(w3_ref.dtype),
        dimension_numbers=(((1,), (1,)), ((), ())),
        preferred_element_type=jnp.float32)                             # (1, tb)
    z = z + b3_ref[...]
    o_ref[0] = jax.nn.sigmoid(z).astype(o_ref.dtype)


def _resident_spec(arr):
    # Full-array block + constant index_map: fetched once, stays VMEM-resident
    # across all grid steps.
    return pl.BlockSpec(arr.shape, lambda i: (0, 0))


def _make_x_spec(tile_b, d, n_buffers):
    idx = lambda i: (i, 0)
    if n_buffers and n_buffers != 2:
        try:
            if "pipeline_mode" in inspect.signature(pl.BlockSpec).parameters:
                return (pl.BlockSpec((tile_b, d), idx,
                                     pipeline_mode=pl.Buffered(int(n_buffers))),
                        True)
        except Exception:
            pass
    return pl.BlockSpec((tile_b, d), idx), False


def _padded_param_bytes(arrays):
    # Resident params, counted with (8, 128) layout padding and double buffering.
    total = 0
    for a in arrays:
        r, c = a.shape
        total += 2 * _round_up(r, _SUBLANES) * _round_up(c, _LANES) * a.dtype.itemsize
    return total


def _vmem_bytes(tile_b, d, in_itemsize, n_x_buffers, param_vmem):
    lane_d = _round_up(max(d, 1), _LANES)           # x lanes pad to 128
    x_bufs = n_x_buffers * tile_b * lane_d * in_itemsize
    intermediates = 3 * tile_b * _LANES * 4         # h1/h2 (+ cast copy), f32, lane-padded
    out_bufs = 2 * _SUBLANES * tile_b * 4           # (1,1,tile_b) f32, sublane-padded, x2 bufs
    return x_bufs + intermediates + out_bufs + param_vmem


def simple_nn_forward(x, params, *, tile_b=None, compute_dtype=None,
                      x_buffers=3, vmem_cap_bytes=36 << 20):
    """Fused Linear(D,32)->ReLU->Linear(32,16)->ReLU->Linear(16,1)->Sigmoid.

    x: [B, D]. Streamed from HBM in its own dtype (pass a bf16 x to halve the
    dominant stream). Matmuls accumulate in f32; bias/ReLU/sigmoid stay f32.
    Returns [B, 1] float32.
    """
    B, D = x.shape
    cd = x.dtype if compute_dtype is None else np.dtype(compute_dtype)
    if x.dtype != cd:
        # NOTE: a standalone cast is an extra full HBM read+write pass over x;
        # prefer producing/storing x in `cd` upstream.
        x = x.astype(cd)

    w1 = params["w1_t"].astype(cd)
    w2 = params["w2_t"].astype(cd)
    w3 = params["w3_r"].astype(cd)
    b1, b2, b3 = params["b1"], params["b2"], params["b3"]   # biases stay f32

    in_itemsize = int(np.dtype(cd).itemsize)
    param_vmem = _padded_param_bytes((w1, b1, w2, b2, w3, b3))

    # ---- tile selection ----------------------------------------------------
    # Granule 128: sublane-legal for f32/bf16/int8 packing of the x block AND a
    # whole number of vregs for the lane-dense output row.
    granule = _LANES
    budget = vmem_cap_bytes - param_vmem - (2 << 20)        # compiler-internal slack
    per_row = (x_buffers * _round_up(max(D, 1), _LANES) * in_itemsize
               + 3 * _LANES * 4 + 2 * _SUBLANES * 4)
    max_tile = max(granule, (budget // per_row) // granule * granule)

    if tile_b is None:
        tile_b = max_tile
        # Keep >= 4 grid steps when the batch allows it so the "parallel" grid
        # axis actually splits across TensorCores (v7x megacore).
        tile_b = min(tile_b, _round_up(_cdiv(B, 4), granule))
    else:
        tile_b = _round_up(max(int(tile_b), granule), granule)
        tile_b = min(tile_b, max_tile)
    tile_b = max(granule, min(tile_b, _round_up(B, granule)))

    num_tiles = _cdiv(B, tile_b)
    mask_tail = (num_tiles * tile_b != B)

    vmem_needed = _vmem_bytes(tile_b, D, in_itemsize, x_buffers, param_vmem)
    # Always set the scoped-VMEM limit (v5e defaults to 16 MiB scoped even though
    # physical is 128 MiB); cap at 48 MiB so it also fits v7x's 64 MiB physical.
    vmem_limit = int(min(max(vmem_needed + (6 << 20), 32 << 20), 48 << 20))

    kernel = functools.partial(_mlp_kernel, batch=B, mask_tail=mask_tail)

    flops = 2 * B * (D * 32 + 32 * 16 + 16) + 5 * B * 48
    cost = pl.CostEstimate(
        flops=int(flops),
        transcendentals=int(B),                 # one exp per row (sigmoid)
        bytes_accessed=int(B * D * in_itemsize + B * 4
                           + sum(int(a.size) * a.dtype.itemsize
                                 for a in (w1, b1, w2, b2, w3, b3))),
    )

    resident = [_resident_spec(a) for a in (w1, b1, w2, b2, w3, b3)]
    out_spec = pl.BlockSpec((1, 1, tile_b), lambda i: (i, 0, 0))
    out_shape = jax.ShapeDtypeStruct((num_tiles, 1, tile_b), jnp.float32)
    compiler_params = pltpu.CompilerParams(
        dimension_semantics=("parallel",), vmem_limit_bytes=vmem_limit)

    def run(x_spec):
        return pl.pallas_call(
            kernel,
            out_shape=out_shape,
            grid=(num_tiles,),
            in_specs=[x_spec] + resident,
            out_specs=out_spec,
            compiler_params=compiler_params,
            cost_estimate=cost,
        )(x, w1, b1, w2, b2, w3, b3)

    x_spec, buffered = _make_x_spec(tile_b, D, x_buffers)
    if buffered:
        try:
            out = run(x_spec)
        except Exception:
            # Fall back to default double buffering if the deeper pipeline_mode
            # isn't supported by this Pallas build.
            out = run(pl.BlockSpec((tile_b, D), lambda i: (i, 0)))
    else:
        out = run(x_spec)

    # (num_tiles, 1, tile_b) flattens row-major into exact batch order.
    return out.reshape(-1)[:B, None]


def init_params(key, input_dim):
    """Deterministic init mimicking nn.Linear defaults.

    PyTorch Linear weight is [out, in]; w1/w2 are stored transposed [in, out] so the
    kernel computes x @ W_t + b on the MXU; w3 keeps the PyTorch [1, 16] row layout
    (it is used as the lhs of the lane-dense final contraction).
    """
    ks = jax.random.split(key, 6)

    def lin(kw, kb, fan_in, fan_out):
        bound = 1.0 / (fan_in ** 0.5)
        w = jax.random.uniform(kw, (fan_out, fan_in), jnp.float32, -bound, bound)
        b = jax.random.uniform(kb, (fan_out,), jnp.float32, -bound, bound)
        return w, b

    w1, b1 = lin(ks[0], ks[1], input_dim, 32)
    w2, b2 = lin(ks[2], ks[3], 32, 16)
    w3, b3 = lin(ks[4], ks[5], 16, 1)
    return {
        "w1_t": w1.T, "b1": b1.reshape(1, 32),
        "w2_t": w2.T, "b2": b2.reshape(1, 16),
        "w3_r": w3,   "b3": b3.reshape(1, 1),
    }


def reference_forward(x, params):
    hp = jax.lax.Precision.HIGHEST
    xf = x.astype(jnp.float32)
    h1 = jnp.maximum(jnp.dot(xf, params["w1_t"], precision=hp) + params["b1"], 0.0)
    h2 = jnp.maximum(jnp.dot(h1, params["w2_t"], precision=hp) + params["b2"], 0.0)
    z = jnp.dot(h2, params["w3_r"].T, precision=hp) + params["b3"]
    return jax.nn.sigmoid(z)


if __name__ == "__main__":
    key = jax.random.PRNGKey(0)
    k_param, k_x1, k_x2 = jax.random.split(key, 3)

    INPUT_DIM = 16
    params = init_params(k_param, INPUT_DIM)

    # Ragged batch (200 = 128 + 72): exercises the partial last block + row mask.
    B1 = 200
    x1 = jax.random.normal(k_x1, (B1, INPUT_DIM), jnp.float32)
    ref1 = reference_forward(x1, params)
    out1 = jax.block_until_ready(simple_nn_forward(x1, params))
    assert out1.shape == (B1, 1)
    assert jnp.allclose(out1, ref1, atol=1e-4, rtol=1e-4), "f32 mismatch vs reference"

    # Evenly tiled batch (no ragged tail) with an explicit tile size.
    B2 = 256
    x2 = jax.random.normal(k_x2, (B2, INPUT_DIM), jnp.float32)
    ref2 = reference_forward(x2, params)
    out2 = jax.block_until_ready(simple_nn_forward(x2, params, tile_b=128))
    assert out2.shape == (B2, 1)
    assert jnp.allclose(out2, ref2, atol=1e-4, rtol=1e-4), "f32 (even grid) mismatch"

    # bf16-in-HBM x stream: halves the dominant HBM traffic; f32 accumulation.
    out_bf16 = jax.block_until_ready(simple_nn_forward(x1.astype(jnp.bfloat16), params))
    assert out_bf16.shape == (B1, 1)
    assert float(jnp.max(jnp.abs(out_bf16 - ref1))) < 5e-2, "bf16 path drifted too far"

    print("KERNEL_OK")
</pallas_src>

<mosaic_0001>
module attributes {stable_mosaic.version = 11 : i64} {
  func.func @_mlp_kernel(%arg0: i32, %arg1: memref<128x16xf32, #tpu.memory_space<vmem>>, %arg2: memref<16x32xf32, #tpu.memory_space<vmem>>, %arg3: memref<1x32xf32, #tpu.memory_space<vmem>>, %arg4: memref<32x16xf32, #tpu.memory_space<vmem>>, %arg5: memref<1x16xf32, #tpu.memory_space<vmem>>, %arg6: memref<1x16xf32, #tpu.memory_space<vmem>>, %arg7: memref<1x1xf32, #tpu.memory_space<vmem>>, %arg8: memref<1x1x128xf32, #tpu.memory_space<vmem>>) attributes {dimension_semantics = [#tpu.dimension_semantics<parallel>], iteration_bounds = array<i64: 2>, scalar_prefetch = 0 : i64, scratch_operands = 0 : i64, tpu.core_type = #tpu.core_type<tc>, window_params = [{transform_indices = @transform_0, window_bounds = array<i64: 128, 16>}, {pipeline_mode = #tpu.pipeline_mode<synchronous>, transform_indices = @transform_1, window_bounds = array<i64: 16, 32>}, {pipeline_mode = #tpu.pipeline_mode<synchronous>, transform_indices = @transform_2, window_bounds = array<i64: 1, 32>}, {pipeline_mode = #tpu.pipeline_mode<synchronous>, transform_indices = @transform_3, window_bounds = array<i64: 32, 16>}, {pipeline_mode = #tpu.pipeline_mode<synchronous>, transform_indices = @transform_4, window_bounds = array<i64: 1, 16>}, {pipeline_mode = #tpu.pipeline_mode<synchronous>, transform_indices = @transform_5, window_bounds = array<i64: 1, 16>}, {pipeline_mode = #tpu.pipeline_mode<synchronous>, transform_indices = @transform_6, window_bounds = array<i64: 1, 1>}, {transform_indices = @transform_7, window_bounds = array<i64: 1, 1, 128>}]} {
    %c0 = arith.constant 0 : index
    %c0_0 = arith.constant 0 : index
    %0 = vector.load %arg1[%c0, %c0_0] : memref<128x16xf32, #tpu.memory_space<vmem>>, vector<128x16xf32>
    %c128_i32 = arith.constant 128 : i32
    %1 = arith.muli %arg0, %c128_i32 : i32
    %2 = tpu.iota {dimensions = array<i32: 0>} : vector<128x16xi32>
    %3 = vector.broadcast %1 : i32 to vector<128x16xi32>
    %4 = arith.addi %3, %2 : vector<128x16xi32>
    %c200_i32 = arith.constant 200 : i32
    %5 = vector.broadcast %c200_i32 : i32 to vector<128x16xi32>
    %6 = arith.cmpi slt, %4, %5 : vector<128x16xi32>
    %cst = arith.constant 0.000000e+00 : f32
    %7 = vector.broadcast %cst : f32 to vector<128x16xf32>
    %8 = arith.select %6, %0, %7 : vector<128x16xi1>, vector<128x16xf32>
    %c0_1 = arith.constant 0 : index
    %c0_2 = arith.constant 0 : index
    %9 = vector.load %arg2[%c0_1, %c0_2] : memref<16x32xf32, #tpu.memory_space<vmem>>, vector<16x32xf32>
    %cst_3 = arith.constant dense<0.000000e+00> : vector<128x32xf32>
    %10 = tpu.matmul %8, %9, %cst_3 {dimension_numbers = #tpu.dot_dimension_numbers<[1], [0], [0], [1], [0, 0, 1, 1], [], []>} : vector<128x16xf32>, vector<16x32xf32>, vector<128x32xf32> -> vector<128x32xf32>
    %c0_4 = arith.constant 0 : index
    %c0_5 = arith.constant 0 : index
    %11 = vector.load %arg3[%c0_4, %c0_5] : memref<1x32xf32, #tpu.memory_space<vmem>>, vector<1x32xf32>
    %12 = vector.broadcast %11 : vector<1x32xf32> to vector<128x32xf32>
    %13 = arith.addf %10, %12 : vector<128x32xf32>
    %cst_6 = arith.constant 0.000000e+00 : f32
    %14 = vector.broadcast %cst_6 : f32 to vector<128x32xf32>
    %15 = arith.maximumf %13, %14 : vector<128x32xf32>
    %c0_7 = arith.constant 0 : index
    %c0_8 = arith.constant 0 : index
    %16 = vector.load %arg4[%c0_7, %c0_8] : memref<32x16xf32, #tpu.memory_space<vmem>>, vector<32x16xf32>
    %cst_9 = arith.constant dense<0.000000e+00> : vector<128x16xf32>
    %17 = tpu.matmul %15, %16, %cst_9 {dimension_numbers = #tpu.dot_dimension_numbers<[1], [0], [0], [1], [0, 0, 1, 1], [], []>} : vector<128x32xf32>, vector<32x16xf32>, vector<128x16xf32> -> vector<128x16xf32>
    %c0_10 = arith.constant 0 : index
    %c0_11 = arith.constant 0 : index
    %18 = vector.load %arg5[%c0_10, %c0_11] : memref<1x16xf32, #tpu.memory_space<vmem>>, vector<1x16xf32>
    %19 = vector.broadcast %18 : vector<1x16xf32> to vector<128x16xf32>
    %20 = arith.addf %17, %19 : vector<128x16xf32>
    %cst_12 = arith.constant 0.000000e+00 : f32
    %21 = vector.broadcast %cst_12 : f32 to vector<128x16xf32>
    %22 = arith.maximumf %20, %21 : vector<128x16xf32>
    %c0_13 = arith.constant 0 : index
    %c0_14 = arith.constant 0 : index
    %23 = vector.load %arg6[%c0_13, %c0_14] : memref<1x16xf32, #tpu.memory_space<vmem>>, vector<1x16xf32>
    %cst_15 = arith.constant dense<0.000000e+00> : vector<1x128xf32>
    %24 = tpu.matmul %23, %22, %cst_15 {dimension_numbers = #tpu.dot_dimension_numbers<[1], [1], [0], [0], [0, 0, 1, 0], [], []>} : vector<1x16xf32>, vector<128x16xf32>, vector<1x128xf32> -> vector<1x128xf32>
    %c0_16 = arith.constant 0 : index
    %c0_17 = arith.constant 0 : index
    %25 = vector.load %arg7[%c0_16, %c0_17] : memref<1x1xf32, #tpu.memory_space<vmem>>, vector<1x1xf32>
    %26 = vector.broadcast %25 : vector<1x1xf32> to vector<1x128xf32>
    %27 = arith.addf %24, %26 : vector<1x128xf32>
    %28 = arith.negf %27 : vector<1x128xf32>
    %29 = math.exp %28 : vector<1x128xf32>
    %cst_18 = arith.constant 1.000000e+00 : f32
    %30 = vector.broadcast %cst_18 : f32 to vector<1x128xf32>
    %31 = arith.addf %30, %29 : vector<1x128xf32>
    %32 = arith.divf %30, %31 : vector<1x128xf32>
    %c0_19 = arith.constant 0 : index
    %c0_20 = arith.constant 0 : index
    %c0_21 = arith.constant 0 : index
    %33 = vector.load %arg8[%c0_19, %c0_20, %c0_21] : memref<1x1x128xf32, #tpu.memory_space<vmem>>, vector<1x1x128xf32>
    %34 = vector.shape_cast %33 : vector<1x1x128xf32> to vector<1x128xf32>
    %35 = vector.shape_cast %32 : vector<1x128xf32> to vector<1x1x128xf32>
    tpu.vector_store %arg8[%c0_19, %c0_20, %c0_21], %35 {strides = array<i32>} : memref<1x1x128xf32, #tpu.memory_space<vmem>>, vector<1x1x128xf32>,
    return
  }
  func.func @transform_0(%arg0: i32) -> (i32, i32) {
    %c0_i32 = arith.constant 0 : i32
    %c0_i32_0 = arith.constant 0 : i32
    return %arg0, %c0_i32 : i32, i32
  }
  func.func @transform_1(%arg0: i32) -> (i32, i32) {
    %c0_i32 = arith.constant 0 : i32
    %c0_i32_0 = arith.constant 0 : i32
    %c0_i32_1 = arith.constant 0 : i32
    return %c0_i32, %c0_i32_0 : i32, i32
  }
  func.func @transform_2(%arg0: i32) -> (i32, i32) {
    %c0_i32 = arith.constant 0 : i32
    %c0_i32_0 = arith.constant 0 : i32
    %c0_i32_1 = arith.constant 0 : i32
    return %c0_i32, %c0_i32_0 : i32, i32
  }
  func.func @transform_3(%arg0: i32) -> (i32, i32) {
    %c0_i32 = arith.constant 0 : i32
    %c0_i32_0 = arith.constant 0 : i32
    %c0_i32_1 = arith.constant 0 : i32
    return %c0_i32, %c0_i32_0 : i32, i32
  }
  func.func @transform_4(%arg0: i32) -> (i32, i32) {
    %c0_i32 = arith.constant 0 : i32
    %c0_i32_0 = arith.constant 0 : i32
    %c0_i32_1 = arith.constant 0 : i32
    return %c0_i32, %c0_i32_0 : i32, i32
  }
  func.func @transform_5(%arg0: i32) -> (i32, i32) {
    %c0_i32 = arith.constant 0 : i32
    %c0_i32_0 = arith.constant 0 : i32
    %c0_i32_1 = arith.constant 0 : i32
    return %c0_i32, %c0_i32_0 : i32, i32
  }
  func.func @transform_6(%arg0: i32) -> (i32, i32) {
    %c0_i32 = arith.constant 0 : i32
    %c0_i32_0 = arith.constant 0 : i32
    %c0_i32_1 = arith.constant 0 : i32
    return %c0_i32, %c0_i32_0 : i32, i32
  }
  func.func @transform_7(%arg0: i32) -> (i32, i32, i32) {
    %c0_i32 = arith.constant 0 : i32
    %c0_i32_0 = arith.constant 0 : i32
    %c0_i32_1 = arith.constant 0 : i32
    return %arg0, %c0_i32, %c0_i32_0 : i32, i32, i32
  }
}

</mosaic_0001>

<bundles_post_ra>
// kernel: tpu_custom_call.1
= control target key start
LH: loop header
LB: loop body
LE: loop exit
PB: predicated region body
PF: predicated region fallthrough
CT: control target
= control target key end

     0   :  { %s1690_s0 = inlined_call_operand.vmem [shape: f32[200,16], index: 0, kind: input, shape index: {}]   ;;  %s1691_s1 = inlined_call_operand.vmem [shape: f32[16,32], index: 1, kind: input, shape index: {}]   ;;  %s1692_s2 = inlined_call_operand.vmem [shape: f32[1,32], index: 2, kind: input, shape index: {}]   ;;  %s1693_s3 = inlined_call_operand.vmem [shape: f32[32,16], index: 3, kind: input, shape index: {}]   ;;  %s1694_s4 = inlined_call_operand.vmem [shape: f32[1,16], index: 4, kind: input, shape index: {}]   ;;  %s1695_s5 = inlined_call_operand.vmem [shape: f32[1,16], index: 5, kind: input, shape index: {}]   ;;  %s1696_s6 = inlined_call_operand.<no memory space> [shape: f32[1,1], index: 6, kind: input, shape index: {}]   ;;  %s1697_s7 = inlined_call_operand.hbm [shape: f32[2,1,128], index: 7, kind: output, shape index: {}]  }
   0x1   :  { %v12_v0 = vstv %s1696_s6 }
   0x2   :  { %13 = vst [vmem:[#allocation2] sm:$0x1] %v12_v0 }
   0x3   :  { %14 = vsyncpa [#allocation4], 0 }
   0x4   :  { %16 = vsyncpa [#allocation4 + $0x1], 0  ;;  %s1446_s26 = smov 0   ;;  %s1448_s27 = smov 0  }
   0x5   :  { %s1450_s28 = smov 0   ;;  %s1452_s29 = smov 0  }
   0x6 LB: > { %s1029_s6 = sadd.s32 4294967295, %s1396_s29   ;;  %s1030_s30 = sadd.s32 4294967294, %s1396_s29   ;;  %s1396_s29 = sphi %s1452_s29, %s1705_s29   ;;  %s1392_s28 = sphi %s1450_s28, %s1704_s28   ;;  %s1388_s27 = sphi %s1448_s27, %s1703_s27   ;;  %s1384_s26 = sphi %s1446_s26, %s1702_s26  }
   0x7   : > { %s1469_s8 = sadd.s32 1, %s1396_s29   ;;  %s181_s9 = sadd.s32 1, %s1392_s28 }
   0x8   : > { %s178_s10 = ssub.s32 %s1396_s29, %s1469_s8  ;;  %p191_p0 = scmp.ne.s32.totalorder %s1392_s28, %s1388_s27 }
   0x9   : > { %p179_p1 = scmp.eq.s32.totalorder %s178_s10, 0  ;;  %p192_p2 = scmp.eq.s32.totalorder %s1029_s6, 1 }
   0xa   : > { %p197_p3 = scmp.ne.s32.totalorder %s1388_s27, %s1384_s26  ;;  %p198_p4 = scmp.eq.s32.totalorder %s1030_s30, 1 }
   0xb   : > { %s1479_s11 = scalar_select %p179_p1, %s1392_s28, %s181_s9  }
   0xc   : > { %p1481_p5 = por %p192_p2, %p191_p0  ;;  %p1485_p6 = por %p198_p4, %p197_p3 }
   0xd   : > { %p1033_p7 = scmp.ge.s32.totalorder %s1396_s29, 1  ;;  %p251_p8 = scmp.lt.s32.totalorder %s1396_s29, 3 }
   0xf   : > { %p252_p9 = pnand %p1033_p7, %p251_p8 }
  0x10   : > { %v383_v1 = vld [vmem:[%s1691_s1] sm:$0xff] (!%p252_p9)  ;;  %v384_v2 = vld [vmem:[%s1691_s1 + $0x8] sm:$0xff] (!%p252_p9)  ;;  %s1497_s18 = sshll.u32 (!%p252_p9), %s1029_s6, 4  ;;  %s1036_s19 = sshll.u32 (!%p252_p9), %s1029_s6, 7  ;;  %v317_v3 = vlaneseq (!%p252_p9)  ;;  %v604_v14 = vld [vmem:[%s1693_s3 + $0x10] sm:$0xff] (!%p252_p9)  ;;  %vm392_vm0 = vcmask (!%p252_p9), 130048  }
  0x11   : > { %255 = sbr.rel (%p252_p9) target bundleno = 785 (0x311), region = 48  ;;  %v602_v4 = vld [vmem:[%s1693_s3] sm:$0xff] (!%p252_p9)  ;;  %v1242_v5 = vpack.c.bf16 (!%p252_p9), %v384_v2, %v383_v1  ;;  %p291_p10 = scmp.lt.s32.totalorder (!%p252_p9), %s1497_s18, 24  ;;  %v1503_v6 = vstv (!%p252_p9), %s1036_s19  ;;  %v603_v7 = vld [vmem:[%s1693_s3 + $0x8] sm:$0xff] (!%p252_p9)  ;;  %v605_v15 = vld [vmem:[%s1693_s3 + $0x18] sm:$0xff] (!%p252_p9) }
  0x12   : > { %v1508_v8 = vshrl.u32 (!%p252_p9), %v317_v3, 7  ;;  %v1246_v9 = vpack.c.bf16 (!%p252_p9), %v603_v7, %v602_v4  ;;  %v1250_v28 = vpack.c.bf16 (!%p252_p9), %v605_v15, %v604_v14 }
  0x13   : > { %1243 = vmatprep.subr.bf16.mxu1 (!%p252_p9), %v1242_v5 }
  0x14   : > { %1245 = vmatpush3.bf16.msra.mxu1 (!%p252_p9), %v1242_v5  ;;  %v335_v10 = vadd.s32 (!%p252_p9), %v1503_v6, %v1508_v8  ;;  %v319_v11 = vadd.s32 (!%p252_p9), 8, %v1508_v8  ;;  %v320_v12 = vadd.s32 (!%p252_p9), 16, %v1508_v8  ;;  %v321_v13 = vadd.s32 (!%p252_p9), 24, %v1508_v8 }
  0x15   : > { %v322_v16 = vadd.s32 (!%p252_p9), 32, %v1508_v8  ;;  %v323_v17 = vadd.s32 (!%p252_p9), 40, %v1508_v8  ;;  %v324_v18 = vadd.s32 (!%p252_p9), 48, %v1508_v8  ;;  %1247 = vmatprep.subr.bf16.mxu1 (!%p252_p9), %v1246_v9  ;;  %v325_v27 = vadd.s32 (!%p252_p9), 56, %v1508_v8 }
  0x16   : > { %vm351_vm1 = vcmp.lt.s32.totalorder (!%p252_p9), %v335_v10, 200  ;;  %v336_v19 = vadd.s32 (!%p252_p9), %v1503_v6, %v319_v11  ;;  %v337_v20 = vadd.s32 (!%p252_p9), %v1503_v6, %v320_v12  ;;  %v338_v21 = vadd.s32 (!%p252_p9), %v1503_v6, %v321_v13 }
  0x17   : > { %v339_v25 = vadd.s32 (!%p252_p9), %v1503_v6, %v322_v16  ;;  %v340_v26 = vadd.s32 (!%p252_p9), %v1503_v6, %v323_v17  ;;  %v341_v34 = vadd.s32 (!%p252_p9), %v1503_v6, %v324_v18  ;;  %v326_v36 = vadd.s32 (!%p252_p9), 64, %v1508_v8 }
  0x18   : > { %s292_s24 = scalar_select %p291_p10, %s1497_s18, 24  ;;  %vm352_vm2 = vcmp.lt.s32.totalorder %v336_v19, 200  ;;  %vm353_vm3 = vcmp.lt.s32.totalorder %v337_v20, 200  ;;  %vm354_vm4 = vcmp.lt.s32.totalorder %v338_v21, 200  ;;  %v342_v39 = vadd.s32 %v1503_v6, %v325_v27 }
  0x19   : > { %vm355_vm5 = vcmp.lt.s32.totalorder %v339_v25, 200  ;;  %vm356_vm6 = vcmp.lt.s32.totalorder %v340_v26, 200  ;;  %v327_v40 = vadd.s32 72, %v1508_v8  ;;  %vm357_vm7 = vcmp.lt.s32.totalorder %v341_v34, 200 }
  0x1a   : > { %s1035_s10 = sshll.u32 %s292_s24, 3  ;;  %v343_v42 = vadd.s32 %v1503_v6, %v326_v36  ;;  %v328_v43 = vadd.s32 80, %v1508_v8  ;;  %vm358_vm8 = vcmp.lt.s32.totalorder %v342_v39, 200  ;;  %v329_v48 = vadd.s32 88, %v1508_v8  ;;  %s284_s24 = sand.u32 1, %s1388_s27  }
  0x1b   : > { %s1528_s16 = scalar_lea.vmem %s1690_s0, %s1035_s10  ;;  %v344_v47 = vadd.s32 %v1503_v6, %v327_v40  ;;  %v330_v51 = vadd.s32 96, %v1508_v8  ;;  %v331_v56 = vadd.s32 104, %v1508_v8  ;;  %v332_v59 = vadd.s32 112, %v1508_v8  ;;  %s285_s25 = scalar_lea.vmem [#allocation3], %s284_s24 }
  0x1c   : > { %v300_v22 = vld [vmem:[%s1528_s16] sm:$0xff]  ;;  %v301_v23 = vld [vmem:[%s1528_s16 + $0x8] sm:$0xff]  ;;  %v302_v24 = vld [vmem:[%s1528_s16 + $0x10] sm:$0xff]  ;;  %vm359_vm9 = vcmp.lt.s32.totalorder %v343_v42, 200  ;;  %v345_v50 = vadd.s32 %v1503_v6, %v328_v43  ;;  %v346_v55 = vadd.s32 %v1503_v6, %v329_v48  ;;  %v333_v0 = vadd.s32 120, %v1508_v8  ;;  %s975_s6 = sshll.u32 %s285_s25, 4  ;;  %s1648_s10 = scalar_lea.hbm %s1697_s7, %s1497_s18  ;;  %s1650_s6 = int_to_ptr.vmem [resolvable:$true] %s975_s6 }
  0x1d   : > { %v367_v29 = vsel %vm351_vm1, %v300_v22, 0.0  ;;  %v303_v30 = vld [vmem:[%s1528_s16 + $0x18] sm:$0xff]  ;;  %v368_v31 = vsel %vm352_vm2, %v301_v23, 0.0  ;;  %v369_v32 = vsel %vm353_vm3, %v302_v24, 0.0  ;;  %v304_v33 = vld [vmem:[%s1528_s16 + $0x20] sm:$0xff]  ;;  %v305_v38 = vld [vmem:[%s1528_s16 + $0x28] sm:$0xff]  ;;  %v347_v58 = vadd.s32 %v1503_v6, %v330_v51 }
  0x1e   : > { %1151 = vmatprep.mubr.msk.f32.mxu1 %vm392_vm0, %v367_v29  ;;  %v370_v35 = vsel %vm354_vm4, %v303_v30, 0.0  ;;  %v371_v37 = vsel %vm355_vm5, %v304_v33, 0.0  ;;  %v306_v41 = vld [vmem:[%s1528_s16 + $0x30] sm:$0xff]  ;;  %v372_v44 = vsel %vm356_vm6, %v305_v38, 0.0  ;;  %v307_v46 = vld [vmem:[%s1528_s16 + $0x38] sm:$0xff]  ;;  %v308_v49 = vld [vmem:[%s1528_s16 + $0x40] sm:$0xff]  ;;  %v348_v63 = vadd.s32 %v1503_v6, %v331_v56 }
  0x1f   : > { %1152 = vmatmul.mubr.msk.f32.vlgmr.msra.gmra.mrb[0].mxu1 %vm392_vm0, %v368_v31  ;;  %v373_v45 = vsel %vm357_vm7, %v306_v41, 0.0  ;;  %v374_v52 = vsel %vm358_vm8, %v307_v46, 0.0  ;;  %v375_v53 = vsel %vm359_vm9, %v308_v49, 0.0  ;;  %v309_v54 = vld [vmem:[%s1528_s16 + $0x48] sm:$0xff]  ;;  %vm360_vm10 = vcmp.lt.s32.totalorder %v344_v47, 200  ;;  %v310_v57 = vld [vmem:[%s1528_s16 + $0x50] sm:$0xff]  ;;  %vm1611_vm4 = vmpackc.low %vm392_vm0, %vm392_vm0 }
  0x20   : > { %1154 = vmatprep.mubr.msk.f32.mxu1 %vm392_vm0, %v369_v32  ;;  %1249 = vmatpush3.bf16.msra.mxu1 %v1246_v9  ;;  %vm361_vm11 = vcmp.lt.s32.totalorder %v345_v50, 200  ;;  %v376_v60 = vsel %vm360_vm10, %v309_v54, 0.0  ;;  %v311_v62 = vld [vmem:[%s1528_s16 + $0x58] sm:$0xff]  ;;  %vm362_vm12 = vcmp.lt.s32.totalorder %v346_v55, 200  ;;  %v312_v1 = vld [vmem:[%s1528_s16 + $0x60] sm:$0xff]  ;;  %vm363_vm13 = vcmp.lt.s32.totalorder %v347_v58, 200 }
  0x21   : > { %1251 = vmatprep.subr.bf16.mxu1 %v1250_v28  ;;  %v377_v61 = vsel %vm361_vm11, %v310_v57, 0.0  ;;  %v349_v2 = vadd.s32 %v1503_v6, %v332_v59  ;;  %v378_v3 = vsel %vm362_vm12, %v311_v62, 0.0  ;;  %v379_v4 = vsel %vm363_vm13, %v312_v1, 0.0  ;;  %v313_v5 = vld [vmem:[%s1528_s16 + $0x68] sm:$0xff]  ;;  %v314_v9 = vld [vmem:[%s1528_s16 + $0x70] sm:$0xff]  ;;  %v315_v12 = vld [vmem:[%s1528_s16 + $0x78] sm:$0xff] }
  0x22   : > { %vm364_vm14 = vcmp.lt.s32.totalorder %v348_v63, 200  ;;  %v350_v7 = vadd.s32 %v1503_v6, %v333_v0  ;;  %v1037_v6 = vld [vmem:[%s1692_s2] ss:$0 sm:$0xff]  ;;  %vm613_vm2 = vcmask 261120   ;;  %v1398_v62 = vmov 0.0|0.0   ;;  %s963_s14 = scalar_lea.sflag [#allocation4], %s284_s24 }
  0x23   : > { %1155 = vmatmul.mubr.msk.f32.gmra.mrb[2].mxu1 %vm392_vm0, %v370_v35  ;;  %vm365_vm15 = vcmp.lt.s32.totalorder %v349_v2, 200  ;;  %v380_v10 = vsel %vm364_vm14, %v313_v5, 0.0  ;;  %1254 = vmatprep.subr.bf16.mxu0 %v1398_v62  ;;  %vm1399_vm3 = vmmov 0   ;;  %v1400_v63 = vmov 0.0   ;;  %v824_v0 = vld [vmem:[#allocation2] sm:$0x1] }
  0x24   : > { %1157 = vmatprep.mubr.msk.f32.mxu1 %vm392_vm0, %v371_v37  ;;  %1253 = vmatpush3.bf16.msra.mxu1 %v1250_v28  ;;  %v381_v11 = vsel %vm365_vm15, %v314_v9, 0.0  ;;  %vm366_vm1 = vcmp.lt.s32.totalorder %v350_v7, 200  ;;  %v1401_v1 = vmov 0   ;;  %v1054_v2 = vld [vmem:[%s1694_s4] ss:$0 sm:$0xff]  ;;  %s1334_s15 = scalar_lea.vmem %s1650_s6, 16 }
  0x25   : > { %v382_v13 = vsel %vm366_vm1, %v315_v12, 0.0  ;;  %1239 = vmatprep.mubr.msk.f32.mxu0 %vm1399_vm3, %v1400_v63  ;;  %1329 = vset.pattern.permute.xlu0 %v1401_v1  ;;  %v832_v63 = vsub.s32 0, %v1508_v8  ;;  %p1335_p11 = scmp.ne.s32.totalorder %s1650_s6, %s1334_s15  ;;  %s1402_s16 = smov [#allocation3]  }
  0x26   : > { %827 = vperm.xlu0 %1329, %v824_v0   ;;  %s1338_s17 = sshll.u32 %s1402_s16, 4  ;;  %s1339_s17 = int_to_ptr.vmem [resolvable:$false] %s1338_s17 }
  0x27   : > { %1158 = vmatmul.mubr.msk.f32.gmra.mrb[4].mxu1 %vm392_vm0, %v372_v44  ;;  %p1336_p12 = pnand %p1335_p11, %p1481_p5  ;;  %s1340_s19 = scalar_lea.vmem %s1339_s17, 32 }
  0x28   : > { %1160 = vmatprep.mubr.msk.f32.mxu1 %vm392_vm0, %v373_v45  ;;  %p1341_p0 = scmp.lt.s32.totalorder %s1650_s6, %s1339_s17  ;;  %p1342_p1 = scmp.lt.s32.totalorder %s1340_s19, %s1334_s15 }
  0x29   : > { %p1337_p13 = pneg %p1336_p12 }
  0x2a   : > { %p1343_p2 = por %p1342_p1, %p1341_p0 }
  0x2b   : > { %1161 = vmatmul.mubr.msk.f32.gmra.mrb[6].mxu1 %vm392_vm0, %v374_v52 }
  0x2c   : > { %1163 = vmatprep.mubr.msk.f32.mxu1 %vm392_vm0, %v375_v53  ;;  %p1344_p3 = pnand %p1343_p2, %p1337_p13 }
  0x2f   : > { %1164 = vmatmul.mubr.msk.f32.gmra.mrb[8].mxu1 %vm392_vm0, %v376_v60 }
  0x30   : > { %1166 = vmatprep.mubr.msk.f32.mxu1 %vm392_vm0, %v377_v61 }
  0x33   : > { %1167 = vmatmul.mubr.msk.f32.gmra.mrb[10].mxu1 %vm392_vm0, %v378_v3 }
  0x34   : > { %1169 = vmatprep.mubr.msk.f32.mxu1 %vm392_vm0, %v379_v4 }
  0x37   : > { %1170 = vmatmul.mubr.msk.f32.gmra.mrb[12].mxu1 %vm392_vm0, %v380_v10 }
  0x38   : > { %1172 = vmatprep.mubr.msk.f32.mxu1 %vm392_vm0, %v381_v11 }
  0x3b   : > { %1173 = vmatmul.mubr.msk.f32.gmra.mrb[14].mxu1 %vm392_vm0, %v382_v13 }
  0xa5   : > { %v828_v0 = vpop.permute.xlu0 %827 }
  0xa6   : > { %v833_v1 = vrot.slane %v828_v0, %v832_v63 }
  0xf2   : > { %v1153_v14 = vpop.f32.mrb[0].mxu1 }
  0xf3   : > { %v513_v15 = vadd.f32 %v1153_v14, %v1037_v6  ;;  %v507_v16 = vpop.f32.mrb[1].mxu1 }
  0xf4   : > { %v508_v17 = vadd.f32 %v1037_v6, %v507_v16 }
  0xf5   : > { %v587_v20 = vmax.f32 %v513_v15, 0.0 }
  0xf6   : > { %v586_v18 = vmax.f32 %v508_v17, 0.0  ;;  %v1156_v19 = vpop.f32.mrb[2].mxu1 }
  0xf7   : > { %v523_v21 = vadd.f32 %v1156_v19, %v1037_v6  ;;  %v517_v22 = vpop.f32.mrb[3].mxu1 }
  0xf8   : > { %v518_v23 = vadd.f32 %v1037_v6, %v517_v22  ;;  %1183 = vmatprep.mubr.msk.f32.mxu1 %vm613_vm2, %v586_v18 }
  0xf9   : > { %v589_v24 = vmax.f32 %v523_v21, 0.0  ;;  %1184 = vmatmul.mubr.msk.f32.vlgmr.msra.gmra.mrb[16].mxu1 %vm613_vm2, %v587_v20 }
  0xfa   : > { %v588_v25 = vmax.f32 %v518_v23, 0.0  ;;  %v1159_v26 = vpop.f32.mrb[4].mxu1 }
  0xfb   : > { %v533_v27 = vadd.f32 %v1159_v26, %v1037_v6  ;;  %v527_v28 = vpop.f32.mrb[5].mxu1 }
  0xfc   : > { %1186 = vmatprep.mubr.msk.f32.mxu1 %vm613_vm2, %v588_v25  ;;  %v528_v29 = vadd.f32 %v1037_v6, %v527_v28 }
  0xfd   : > { %1187 = vmatmul.mubr.msk.f32.gmra.mrb[18].mxu1 %vm613_vm2, %v589_v24  ;;  %v591_v30 = vmax.f32 %v533_v27, 0.0 }
  0xfe   : > { %v590_v31 = vmax.f32 %v528_v29, 0.0  ;;  %v1162_v32 = vpop.f32.mrb[6].mxu1 }
  0xff   : > { %v543_v33 = vadd.f32 %v1162_v32, %v1037_v6  ;;  %v537_v34 = vpop.f32.mrb[7].mxu1 }
 0x100   : > { %1189 = vmatprep.mubr.msk.f32.mxu1 %vm613_vm2, %v590_v31  ;;  %v538_v35 = vadd.f32 %v1037_v6, %v537_v34 }
 0x101   : > { %1190 = vmatmul.mubr.msk.f32.gmra.mrb[20].mxu1 %vm613_vm2, %v591_v30  ;;  %v593_v36 = vmax.f32 %v543_v33, 0.0 }
 0x102   : > { %v592_v37 = vmax.f32 %v538_v35, 0.0  ;;  %v1165_v38 = vpop.f32.mrb[8].mxu1 }
 0x103   : > { %v553_v39 = vadd.f32 %v1165_v38, %v1037_v6  ;;  %v547_v40 = vpop.f32.mrb[9].mxu1 }
 0x104   : > { %1192 = vmatprep.mubr.msk.f32.mxu1 %vm613_vm2, %v592_v37  ;;  %v548_v41 = vadd.f32 %v1037_v6, %v547_v40 }
 0x105   : > { %1193 = vmatmul.mubr.msk.f32.gmra.mrb[22].mxu1 %vm613_vm2, %v593_v36  ;;  %v595_v42 = vmax.f32 %v553_v39, 0.0 }
 0x106   : > { %v594_v43 = vmax.f32 %v548_v41, 0.0  ;;  %v1168_v44 = vpop.f32.mrb[10].mxu1 }
 0x107   : > { %v563_v45 = vadd.f32 %v1168_v44, %v1037_v6  ;;  %v557_v46 = vpop.f32.mrb[11].mxu1 }
 0x108   : > { %1195 = vmatprep.mubr.msk.f32.mxu1 %vm613_vm2, %v594_v43  ;;  %v558_v47 = vadd.f32 %v1037_v6, %v557_v46 }
 0x109   : > { %1196 = vmatmul.mubr.msk.f32.gmra.mrb[24].mxu1 %vm613_vm2, %v595_v42  ;;  %v597_v48 = vmax.f32 %v563_v45, 0.0 }
 0x10a   : > { %v596_v49 = vmax.f32 %v558_v47, 0.0  ;;  %v1171_v50 = vpop.f32.mrb[12].mxu1 }
 0x10b   : > { %v573_v51 = vadd.f32 %v1171_v50, %v1037_v6  ;;  %v567_v52 = vpop.f32.mrb[13].mxu1 }
 0x10c   : > { %1198 = vmatprep.mubr.msk.f32.mxu1 %vm613_vm2, %v596_v49  ;;  %v568_v53 = vadd.f32 %v1037_v6, %v567_v52 }
 0x10d   : > { %1199 = vmatmul.mubr.msk.f32.gmra.mrb[26].mxu1 %vm613_vm2, %v597_v48  ;;  %v599_v54 = vmax.f32 %v573_v51, 0.0 }
 0x10e   : > { %v598_v55 = vmax.f32 %v568_v53, 0.0  ;;  %v1174_v56 = vpop.f32.mrb[14].mxu1 }
 0x10f   : > { %v583_v57 = vadd.f32 %v1174_v56, %v1037_v6  ;;  %v577_v58 = vpop.f32.mrb[15].mxu1 }
 0x110   : > { %1201 = vmatprep.mubr.msk.f32.mxu1 %vm613_vm2, %v598_v55  ;;  %v578_v59 = vadd.f32 %v1037_v6, %v577_v58 }
 0x111   : > { %1202 = vmatmul.mubr.msk.f32.gmra.mrb[28].mxu1 %vm613_vm2, %v599_v54  ;;  %v601_v60 = vmax.f32 %v583_v57, 0.0 }
 0x112   : > { %v600_v61 = vmax.f32 %v578_v59, 0.0 }
 0x114   : > { %1204 = vmatprep.mubr.msk.f32.mxu1 %vm613_vm2, %v600_v61  ;;  %v823_v61 = vld [vmem:[%s1695_s5] sm:$0x1] }
 0x115   : > { %1205 = vmatmul.mubr.msk.f32.gmra.mrb[30].mxu1 %vm613_vm2, %v601_v60 }
 0x1cc   : > { %v1185_v3 = vpop.f32.mrb[16].mxu1 }
 0x1cd   : > { %v734_v4 = vadd.f32 %v1185_v3, %v1054_v2  ;;  %v728_v5 = vpop.f32.mrb[17].mxu1 }
 0x1ce   : > { %v729_v7 = vadd.f32 %v1054_v2, %v728_v5 }
 0x1cf   : > { %v808_v9 = vmax.f32 %v734_v4, 0.0 }
 0x1d0   : > { %v807_v10 = vmax.f32 %v729_v7, 0.0  ;;  %v1188_v11 = vpop.f32.mrb[18].mxu1 }
 0x1d1   : > { %v744_v12 = vadd.f32 %v1188_v11, %v1054_v2  ;;  %v738_v13 = vpop.f32.mrb[19].mxu1 }
 0x1d2   : > { %v1255_v14 = vpack.c.bf16 %v808_v9, %v807_v10  ;;  %v739_v15 = vadd.f32 %v1054_v2, %v738_v13 }
 0x1d3   : > { %v810_v16 = vmax.f32 %v744_v12, 0.0 }
 0x1d4   : > { %v809_v17 = vmax.f32 %v739_v15, 0.0  ;;  %1257 = vmatpush3.bf16.xpose.msk.msra.mxu0 %vm1611_vm4, %v1255_v14  ;;  %v1191_v18 = vpop.f32.mrb[20].mxu1 }
 0x1d5   : > { %v754_v19 = vadd.f32 %v1191_v18, %v1054_v2  ;;  %v748_v20 = vpop.f32.mrb[21].mxu1  ;;  %1258 = vmatprep.subr.bf16.mxu0 %v1398_v62 }
 0x1d6   : > { %v1259_v21 = vpack.c.bf16 %v810_v16, %v809_v17  ;;  %v749_v22 = vadd.f32 %v1054_v2, %v748_v20 }
 0x1d7   : > { %v812_v23 = vmax.f32 %v754_v19, 0.0 }
 0x1d8   : > { %v811_v24 = vmax.f32 %v749_v22, 0.0  ;;  %v1194_v25 = vpop.f32.mrb[22].mxu1 }
 0x1d9   : > { %v764_v26 = vadd.f32 %v1194_v25, %v1054_v2  ;;  %v758_v27 = vpop.f32.mrb[23].mxu1 }
 0x1da   : > { %v1263_v28 = vpack.c.bf16 %v812_v23, %v811_v24  ;;  %v759_v29 = vadd.f32 %v1054_v2, %v758_v27 }
 0x1db   : > { %v814_v30 = vmax.f32 %v764_v26, 0.0 }
 0x1dc   : > { %1261 = vmatpush3.bf16.xpose.msk.msra.mxu0 %vm1611_vm4, %v1259_v21  ;;  %v813_v31 = vmax.f32 %v759_v29, 0.0  ;;  %v1197_v32 = vpop.f32.mrb[24].mxu1 }
 0x1dd   : > { %1262 = vmatprep.subr.bf16.mxu0 %v1398_v62  ;;  %v774_v33 = vadd.f32 %v1197_v32, %v1054_v2  ;;  %v768_v34 = vpop.f32.mrb[25].mxu1 }
 0x1de   : > { %v1267_v35 = vpack.c.bf16 %v814_v30, %v813_v31  ;;  %v769_v36 = vadd.f32 %v1054_v2, %v768_v34 }
 0x1df   : > { %v816_v37 = vmax.f32 %v774_v33, 0.0 }
 0x1e0   : > { %v815_v38 = vmax.f32 %v769_v36, 0.0  ;;  %v1200_v39 = vpop.f32.mrb[26].mxu1 }
 0x1e1   : > { %v784_v40 = vadd.f32 %v1200_v39, %v1054_v2  ;;  %v778_v41 = vpop.f32.mrb[27].mxu1 }
 0x1e2   : > { %v1271_v42 = vpack.c.bf16 %v816_v37, %v815_v38  ;;  %v779_v43 = vadd.f32 %v1054_v2, %v778_v41 }
 0x1e3   : > { %v818_v44 = vmax.f32 %v784_v40, 0.0 }
 0x1e4   : > { %1265 = vmatpush3.bf16.xpose.msk.msra.mxu0 %vm1611_vm4, %v1263_v28  ;;  %v817_v45 = vmax.f32 %v779_v43, 0.0  ;;  %v1203_v46 = vpop.f32.mrb[28].mxu1 }
 0x1e5   : > { %1266 = vmatprep.subr.bf16.mxu0 %v1398_v62  ;;  %v794_v47 = vadd.f32 %v1203_v46, %v1054_v2  ;;  %v788_v48 = vpop.f32.mrb[29].mxu1 }
 0x1e6   : > { %v1275_v49 = vpack.c.bf16 %v818_v44, %v817_v45  ;;  %v789_v50 = vadd.f32 %v1054_v2, %v788_v48 }
 0x1e7   : > { %v820_v51 = vmax.f32 %v794_v47, 0.0 }
 0x1e8   : > { %v819_v52 = vmax.f32 %v789_v50, 0.0  ;;  %v1206_v53 = vpop.f32.mrb[30].mxu1 }
 0x1e9   : > { %v804_v54 = vadd.f32 %v1206_v53, %v1054_v2  ;;  %v798_v55 = vpop.f32.mrb[31].mxu1 }
 0x1ea   : > { %v1279_v56 = vpack.c.bf16 %v820_v51, %v819_v52  ;;  %v799_v57 = vadd.f32 %v1054_v2, %v798_v55 }
 0x1eb   : > { %v822_v58 = vmax.f32 %v804_v54, 0.0 }
 0x1ec   : > { %1269 = vmatpush3.bf16.xpose.msk.msra.mxu0 %vm1611_vm4, %v1267_v35  ;;  %v821_v59 = vmax.f32 %v799_v57, 0.0 }
 0x1ed   : > { %1270 = vmatprep.subr.bf16.mxu0 %v1398_v62 }
 0x1ee   : > { %v1283_v60 = vpack.c.bf16 %v822_v58, %v821_v59 }
 0x1f4   : > { %1273 = vmatpush3.bf16.xpose.msk.msra.mxu0 %vm1611_vm4, %v1271_v42 }
 0x1f5   : > { %1274 = vmatprep.subr.bf16.mxu0 %v1398_v62 }
 0x1fc   : > { %1277 = vmatpush3.bf16.xpose.msk.msra.mxu0 %vm1611_vm4, %v1275_v49 }
 0x1fd   : > { %1278 = vmatprep.subr.bf16.mxu0 %v1398_v62 }
 0x204   : > { %1281 = vmatpush3.bf16.xpose.msk.msra.mxu0 %vm1611_vm4, %v1279_v56 }
 0x205   : > { %1282 = vmatprep.subr.bf16.mxu0 %v1398_v62 }
 0x20c   : > { %1285 = vmatpush3.bf16.xpose.msk.msra.mxu0 %vm1611_vm4, %v1283_v60 }
 0x213   : > { %1240 = vmatmul.mubr.msk.f32.vlgmr.msra.gmra.mrb[0].mxu0 %vm392_vm0, %v823_v61 }
 0x2e6   : > { %v951_v2 = vpop.f32.mrb[0].mxu0 }
 0x2e7   : > { %v952_v3 = vadd.f32 %v951_v2, %v833_v1  ;;  %v1241_v4 = vpop.f32.mrb[1].mxu0 }
 0x2e9   : > { %v1088_v5 = vmul.f32 -1.442695, %v952_v3 }
 0x2eb   : > { %1330 = vpow2.f32 %v1088_v5 }
 0x2f5   : > { %v1331_v62 = vpop.eup %1330 }
 0x2f6   : > { %v958_v7 = vadd.f32 1.0, %v1331_v62 }
 0x2f8   : > { %1332 = vrcp.f32 %v958_v7 }
 0x302   : > { %v1333_v8 = vpop.eup %1332 }
 0x303   : > { %961 = vst [vmem:[%s285_s25] sm:$0x1] %v1333_v8 }
 0x304   : > { %1347 = shalt.err (!%p1344_p3)
}
 0x305   : > { %s1348_s18 = scalar_lea.hbm %s1648_s10, 16  ;;  %s1352_s22 = scalar_lea.hbm %s1697_s7, 32 }
 0x306   : > { %p1349_p4 = scmp.ne.s32.totalorder %s1648_s10, %s1348_s18  ;;  %p1353_p9 = scmp.lt.u32.totalorder %s1648_s10, %s1697_s7 }
 0x307   : > { %p1354_p10 = scmp.lt.u32.totalorder %s1352_s22, %s1348_s18  ;;  %p1356_p12 = scmp.lt.u32.totalorder %s1348_s18, %s1648_s10 }
 0x308   : > { %p1350_p7 = pnand %p1349_p4, %p1481_p5 }
 0x309   : > { %p1355_p11 = por %p1354_p10, %p1353_p9 }
 0x30a   : > { %p1351_p8 = pneg %p1350_p7 }
 0x30b   : > { %p1357_p13 = por %p1356_p12, %p1355_p11 }
 0x30d   : > { %p1358_p0 = pnand %p1357_p13, %p1351_p8 }
 0x30f   : > { %1361 = shalt.err (!%p1358_p0)
}
 0x310   : > { %1286 = dma.vmem_to_hbm [thread:$0]  (%p1481_p5), %s1650_s6, 16, %s1648_s10, %s963_s14  }
 0x311 PF: > { %p1292_p1 = scmp.ge.s32.totalorder %s1396_s29, 2  ;;  %s987_s25 = sand.u32 1, %s1384_s26  }
 0x312   : > { %s988_s30 = scalar_lea.sflag [#allocation4], %s987_s25 }
 0x313   : > { %p1289_p2 = pnand %p1292_p1, %p1485_p6 }
 0x315   : > { %1379 = dma.done.wait (!%p1289_p2), %s988_s30, 16  }
 0x316   : > { %1381 = vsyncadd (!%p1289_p2), %s988_s30, 4294967280  ;;  %p19_p3 = scmp.ge.s32.totalorder %s1469_s8, 4   ;;  %s1702_s26 = smov %s1388_s27 }
 0x317   : > { %s1703_s27 = smov %s1392_s28  ;;  %s1704_s28 = smov %s1479_s11 }
 0x318   : > { %s1705_s29 = smov %s1469_s8  ;;  %21 = sbr.rel (!%p19_p3) target bundleno = 6 (0x6), region = 83 }
 0x31f   :  { %992 = vsyncpa [#allocation4], 1 }
 0x320   :  { %994 = vsyncpa [#allocation4 + $0x1], 1 }

</bundles_post_ra>
